<compile_context>
chip_gen: v7x
topology: tpu7x:2x2x1
jax: 0.10.0
libtpu: 0.0.40
codegen_flags: <defaults>
</compile_context>

<pallas_src>
import functools
import math

import jax
import jax.numpy as jnp
from jax import lax
from jax.experimental import pallas as pl
from jax.experimental.pallas import tpu as pltpu

_LANE = 128
_SUBLANE = 8


def _round_up(x: int, m: int) -> int:
    return ((x + m - 1) // m) * m


def _cdiv(a: int, b: int) -> int:
    return (a + b - 1) // b


def _diou_kernel(x_ref, out_ref, *, wh_to_xy: bool, eps: float,
                 fused_sum: bool, m_total: int, chunk: int):
    # x_ref: (8, TILE_R, C) coord-major packed boxes
    #   rows 0..3 = predict (cx,cy,w,h | x1,y1,x2,y2), rows 4..7 = target.
    tile_r = x_ref.shape[1]
    C = x_ref.shape[2]
    n_chunks = tile_r // chunk

    def compute(r0):
        sl = pl.ds(r0, chunk)
        p0 = x_ref[0, sl, :]
        p1 = x_ref[1, sl, :]
        p2 = x_ref[2, sl, :]
        p3 = x_ref[3, sl, :]
        t0 = x_ref[4, sl, :]
        t1 = x_ref[5, sl, :]
        t2 = x_ref[6, sl, :]
        t3 = x_ref[7, sl, :]

        if wh_to_xy:
            # cxcywh -> xyxy; centers/areas come straight from the input
            # (cx, cy, w*h) instead of being re-derived from the corners.
            phw = p2 * 0.5
            phh = p3 * 0.5
            thw = t2 * 0.5
            thh = t3 * 0.5
            px1 = p0 - phw
            py1 = p1 - phh
            px2 = p0 + phw
            py2 = p1 + phh
            tx1 = t0 - thw
            ty1 = t1 - thh
            tx2 = t0 + thw
            ty2 = t1 + thh
            area_p = p2 * p3
            area_t = t2 * t3
            cxp, cyp, cxt, cyt = p0, p1, t0, t1
        else:
            px1, py1, px2, py2 = p0, p1, p2, p3
            tx1, ty1, tx2, ty2 = t0, t1, t2, t3
            area_p = (px2 - px1) * (py2 - py1)
            area_t = (tx2 - tx1) * (ty2 - ty1)
            cxp = (px2 + px1) * 0.5
            cyp = (py2 + py1) * 0.5
            cxt = (tx2 + tx1) * 0.5
            cyt = (ty2 + ty1) * 0.5

        # intersection / union / IoU (exact divides for accuracy)
        iw = jnp.maximum(jnp.minimum(px2, tx2) - jnp.maximum(px1, tx1), 0.0)
        ih = jnp.maximum(jnp.minimum(py2, ty2) - jnp.maximum(py1, ty1), 0.0)
        inters = iw * ih
        uni = area_p + area_t - inters
        iou = inters / (uni + eps)

        # center-distance and enclosing-diagonal terms
        inter_diag = (cxt - cxp) ** 2 + (cyt - cyp) ** 2
        ow = jnp.maximum(px2, tx2) - jnp.minimum(px1, tx1)
        oh = jnp.maximum(py2, ty2) - jnp.minimum(py1, ty1)
        outer_diag = ow * ow + oh * oh

        d_iou = iou - inter_diag / (outer_diag + eps)
        return jnp.clip(d_iou, -1.0, 1.0)

    if fused_sum:
        # Emit per-block lane partial sums of (1 - d_iou); padded boxes masked.
        base = pl.program_id(0) * tile_r

        def body(i, acc):
            r0 = pl.multiple_of(i * chunk, chunk)
            d = compute(r0)
            row = base + r0 + lax.broadcasted_iota(jnp.int32, (chunk, C), 0)
            col = lax.broadcasted_iota(jnp.int32, (chunk, C), 1)
            valid = (row * C + col) < m_total
            loss = jnp.where(valid, 1.0 - d, 0.0)
            return acc + jnp.sum(loss, axis=0, keepdims=True)

        acc = lax.fori_loop(0, n_chunks, body,
                            jnp.zeros((1, C), jnp.float32), unroll=True)
        out_ref[...] = jnp.broadcast_to(acc, out_ref.shape)
    else:
        def body(i, carry):
            r0 = pl.multiple_of(i * chunk, chunk)
            out_ref[pl.ds(r0, chunk), :] = compute(r0)
            return carry

        lax.fori_loop(0, n_chunks, body, 0, unroll=True)


def diou_loss(predict, target, *, reduction="none", wh_to_xy=True,
              return_d_iou=False, eps=1e-7):
    """predict/target: [..., N, 4]  (cxcywh if wh_to_xy else xyxy)."""
    predict = jnp.asarray(predict, jnp.float32)
    target = jnp.asarray(target, jnp.float32)
    assert predict.shape == target.shape and predict.shape[-1] == 4
    *lead, N, _ = predict.shape
    lead = tuple(lead)
    B = math.prod(lead) if lead else 1
    M = B * N  # total boxes

    fused_sum = (not return_d_iou) and reduction in ("mean", "sum")

    # ---- pack both inputs coord-major: (M, 8) -> (8, M) ----
    # TODO(synk): extra HBM pass; vanishes if callers supply coord-major boxes.
    x = jnp.concatenate(
        [predict.reshape(M, 4), target.reshape(M, 4)], axis=-1).T  # (8, M)

    # ---- lane/sublane tiling of the box axis: (R rows, C lanes) ----
    if M <= _SUBLANE * _LANE:
        # tiny: one (8, 1, C) block, C <= 1024 lanes
        C = _round_up(max(M, 1), _LANE)
        R = 1
        tile_r = 1
        chunk = 1
    else:
        C = 512
        R0 = _cdiv(M, C)
        # ~4 MiB input blocks (8*256*512*4B); keep >= 2 blocks so the parallel
        # grid axis shards across both v7x TensorCores; pad rows to a full
        # multiple of tile_r so every DMA / store is unmasked.
        n_blocks = max(2, _cdiv(R0, 256))
        tile_r = _round_up(_cdiv(R0, n_blocks), _SUBLANE)
        R = _round_up(R0, tile_r)
        chunk = _SUBLANE
    grid_r = R // tile_r
    Mp = R * C

    if Mp != M:
        # benign padding boxes; masked (fused path) or sliced off (full path)
        x = jnp.pad(x, ((0, 0), (0, Mp - M)), constant_values=1.0)
    x = x.reshape(8, R, C)

    kernel = functools.partial(_diou_kernel, wh_to_xy=wh_to_xy, eps=eps,
                               fused_sum=fused_sum, m_total=M, chunk=chunk)

    if fused_sum:
        psums = pl.pallas_call(
            kernel,
            out_shape=jax.ShapeDtypeStruct((grid_r * _SUBLANE, C), jnp.float32),
            grid=(grid_r,),
            in_specs=[pl.BlockSpec((8, tile_r, C), lambda i: (0, i, 0))],
            out_specs=pl.BlockSpec((_SUBLANE, C), lambda i: (i, 0)),
            compiler_params=pltpu.CompilerParams(
                dimension_semantics=("parallel",)),
        )(x)
        # every row of each 8-row block holds the same lane partial sums
        total = jnp.sum(psums.reshape(grid_r, _SUBLANE, C)[:, 0, :])
        if reduction == "mean":
            return total / M
        return total / N  # 'sum': sum over leading dims of per-row means

    diou2d = pl.pallas_call(
        kernel,
        out_shape=jax.ShapeDtypeStruct((R, C), jnp.float32),
        grid=(grid_r,),
        in_specs=[pl.BlockSpec((8, tile_r, C), lambda i: (0, i, 0))],
        out_specs=pl.BlockSpec((tile_r, C), lambda i: (i, 0)),
        compiler_params=pltpu.CompilerParams(
            dimension_semantics=("parallel",)),
    )(x)

    d_iou = diou2d.reshape(Mp)[:M].reshape(lead + (N,))
    loss = jnp.mean(1.0 - d_iou, axis=-1)
    if reduction == "mean":
        loss = jnp.mean(loss)
    elif reduction == "sum":
        loss = jnp.sum(loss)
    if return_d_iou:
        return loss, d_iou
    return loss


def _reference(predict, target, eps=1e-7):
    """Pure-JAX reference mirroring the PyTorch forward (wh_to_xy=True)."""
    cx, cy, w, h = [predict[..., i] for i in range(4)]
    p = jnp.stack([cx - w / 2, cy - h / 2, cx + w / 2, cy + h / 2], axis=-1)
    cx, cy, w, h = [target[..., i] for i in range(4)]
    t = jnp.stack([cx - w / 2, cy - h / 2, cx + w / 2, cy + h / 2], axis=-1)

    ix1 = jnp.maximum(p[..., 0], t[..., 0])
    iy1 = jnp.maximum(p[..., 1], t[..., 1])
    ix2 = jnp.minimum(p[..., 2], t[..., 2])
    iy2 = jnp.minimum(p[..., 3], t[..., 3])
    iw = jnp.clip(ix2 - ix1, 0.0)
    ih = jnp.clip(iy2 - iy1, 0.0)
    inters = iw * ih
    uni = ((p[..., 2] - p[..., 0]) * (p[..., 3] - p[..., 1])
           + (t[..., 2] - t[..., 0]) * (t[..., 3] - t[..., 1]) - inters)
    iou = inters / (uni + eps)
    cxp = (p[..., 2] + p[..., 0]) / 2
    cyp = (p[..., 3] + p[..., 1]) / 2
    cxt = (t[..., 2] + t[..., 0]) / 2
    cyt = (t[..., 3] + t[..., 1]) / 2
    inter_diag = (cxt - cxp) ** 2 + (cyt - cyp) ** 2
    ox1 = jnp.minimum(p[..., 0], t[..., 0])
    oy1 = jnp.minimum(p[..., 1], t[..., 1])
    ox2 = jnp.maximum(p[..., 2], t[..., 2])
    oy2 = jnp.maximum(p[..., 3], t[..., 3])
    outer_diag = (ox1 - ox2) ** 2 + (oy1 - oy2) ** 2
    d_iou = jnp.clip(iou - inter_diag / outer_diag, -1.0, 1.0)
    return jnp.mean(1.0 - d_iou, axis=-1), d_iou


def _rand_boxes(key, shape_prefix):
    k1, k2 = jax.random.split(key)
    centers = jax.random.uniform(k1, shape_prefix + (2,), jnp.float32, 0.0, 10.0)
    sizes = jax.random.uniform(k2, shape_prefix + (2,), jnp.float32, 0.5, 5.0)
    return jnp.concatenate([centers, sizes], axis=-1)


if __name__ == "__main__":
    key = jax.random.PRNGKey(0)

    # ---- case 1: small (tiny single-block path) ----
    B, N = 2, 128
    k1, k2, k3, k4 = jax.random.split(key, 4)
    predict = _rand_boxes(k1, (B, N))
    target = _rand_boxes(k2, (B, N))

    loss, d_iou = diou_loss(predict, target, reduction="none",
                            wh_to_xy=True, return_d_iou=True)
    jax.block_until_ready((loss, d_iou))
    ref_loss, ref_diou = _reference(predict, target)
    assert loss.shape == (B,) and d_iou.shape == (B, N)
    assert jnp.allclose(loss, ref_loss, atol=1e-4, rtol=0.0)
    assert jnp.allclose(d_iou, ref_diou, atol=1e-4, rtol=0.0)

    loss_mean = diou_loss(predict, target, reduction="mean")  # fused-sum path
    jax.block_until_ready(loss_mean)
    assert jnp.allclose(loss_mean, jnp.mean(ref_loss), atol=1e-4, rtol=0.0)

    # wh_to_xy=False path (same boxes pre-converted to xyxy)
    def to_xyxy(b):
        cx, cy, w, h = b[..., 0], b[..., 1], b[..., 2], b[..., 3]
        return jnp.stack([cx - w / 2, cy - h / 2, cx + w / 2, cy + h / 2], -1)
    loss_xy, d_iou_xy = diou_loss(to_xyxy(predict), to_xyxy(target),
                                  reduction="none", wh_to_xy=False,
                                  return_d_iou=True)
    jax.block_until_ready((loss_xy, d_iou_xy))
    assert jnp.allclose(d_iou_xy, ref_diou, atol=1e-4, rtol=0.0)

    # ---- case 2: multi-block path with row padding + masked fused sum ----
    B2, N2 = 4, 1500
    predict2 = _rand_boxes(k3, (B2, N2))
    target2 = _rand_boxes(k4, (B2, N2))
    loss2, d_iou2 = diou_loss(predict2, target2, reduction="none",
                              wh_to_xy=True, return_d_iou=True)
    jax.block_until_ready((loss2, d_iou2))
    ref_loss2, ref_diou2 = _reference(predict2, target2)
    assert loss2.shape == (B2,) and d_iou2.shape == (B2, N2)
    assert jnp.allclose(loss2, ref_loss2, atol=1e-4, rtol=0.0)
    assert jnp.allclose(d_iou2, ref_diou2, atol=1e-4, rtol=0.0)

    loss2_sum = diou_loss(predict2, target2, reduction="sum")  # fused-sum path
    jax.block_until_ready(loss2_sum)
    assert jnp.allclose(loss2_sum, jnp.sum(ref_loss2), atol=1e-3, rtol=1e-5)

    print("KERNEL_OK")
</pallas_src>

<mosaic_0001>
module attributes {stable_mosaic.version = 11 : i64} {
  func.func @_diou_kernel(%arg0: i32, %arg1: memref<8x1x256xf32, #tpu.memory_space<vmem>>, %arg2: memref<1x256xf32, #tpu.memory_space<vmem>>) attributes {dimension_semantics = [#tpu.dimension_semantics<parallel>], iteration_bounds = array<i64: 1>, scalar_prefetch = 0 : i64, scratch_operands = 0 : i64, tpu.core_type = #tpu.core_type<tc>, window_params = [{transform_indices = @transform_0, window_bounds = array<i64: 8, 1, 256>}, {transform_indices = @transform_1, window_bounds = array<i64: 1, 256>}]} {
    %c0_i32 = arith.constant 0 : i32
    %c1_i32 = arith.constant 1 : i32
    %0 = arith.muli %c0_i32, %c1_i32 : i32
    %1 = tpu.assume_multiple %0, 1 : i32
    %c0 = arith.constant 0 : index
    %2 = arith.index_cast %1 : i32 to index
    %c0_0 = arith.constant 0 : index
    %3 = vector.load %arg1[%c0, %2, %c0_0] : memref<8x1x256xf32, #tpu.memory_space<vmem>>, vector<1x1x256xf32>
    %4 = vector.shape_cast %3 : vector<1x1x256xf32> to vector<1x256xf32>
    %c1 = arith.constant 1 : index
    %5 = arith.index_cast %1 : i32 to index
    %c0_1 = arith.constant 0 : index
    %6 = vector.load %arg1[%c1, %5, %c0_1] : memref<8x1x256xf32, #tpu.memory_space<vmem>>, vector<1x1x256xf32>
    %7 = vector.shape_cast %6 : vector<1x1x256xf32> to vector<1x256xf32>
    %c2 = arith.constant 2 : index
    %8 = arith.index_cast %1 : i32 to index
    %c0_2 = arith.constant 0 : index
    %9 = vector.load %arg1[%c2, %8, %c0_2] : memref<8x1x256xf32, #tpu.memory_space<vmem>>, vector<1x1x256xf32>
    %10 = vector.shape_cast %9 : vector<1x1x256xf32> to vector<1x256xf32>
    %c3 = arith.constant 3 : index
    %11 = arith.index_cast %1 : i32 to index
    %c0_3 = arith.constant 0 : index
    %12 = vector.load %arg1[%c3, %11, %c0_3] : memref<8x1x256xf32, #tpu.memory_space<vmem>>, vector<1x1x256xf32>
    %13 = vector.shape_cast %12 : vector<1x1x256xf32> to vector<1x256xf32>
    %c4 = arith.constant 4 : index
    %14 = arith.index_cast %1 : i32 to index
    %c0_4 = arith.constant 0 : index
    %15 = vector.load %arg1[%c4, %14, %c0_4] : memref<8x1x256xf32, #tpu.memory_space<vmem>>, vector<1x1x256xf32>
    %16 = vector.shape_cast %15 : vector<1x1x256xf32> to vector<1x256xf32>
    %c5 = arith.constant 5 : index
    %17 = arith.index_cast %1 : i32 to index
    %c0_5 = arith.constant 0 : index
    %18 = vector.load %arg1[%c5, %17, %c0_5] : memref<8x1x256xf32, #tpu.memory_space<vmem>>, vector<1x1x256xf32>
    %19 = vector.shape_cast %18 : vector<1x1x256xf32> to vector<1x256xf32>
    %c6 = arith.constant 6 : index
    %20 = arith.index_cast %1 : i32 to index
    %c0_6 = arith.constant 0 : index
    %21 = vector.load %arg1[%c6, %20, %c0_6] : memref<8x1x256xf32, #tpu.memory_space<vmem>>, vector<1x1x256xf32>
    %22 = vector.shape_cast %21 : vector<1x1x256xf32> to vector<1x256xf32>
    %c7 = arith.constant 7 : index
    %23 = arith.index_cast %1 : i32 to index
    %c0_7 = arith.constant 0 : index
    %24 = vector.load %arg1[%c7, %23, %c0_7] : memref<8x1x256xf32, #tpu.memory_space<vmem>>, vector<1x1x256xf32>
    %25 = vector.shape_cast %24 : vector<1x1x256xf32> to vector<1x256xf32>
    %cst = arith.constant 5.000000e-01 : f32
    %26 = vector.broadcast %cst : f32 to vector<1x256xf32>
    %27 = arith.mulf %10, %26 : vector<1x256xf32>
    %cst_8 = arith.constant 5.000000e-01 : f32
    %28 = vector.broadcast %cst_8 : f32 to vector<1x256xf32>
    %29 = arith.mulf %13, %28 : vector<1x256xf32>
    %cst_9 = arith.constant 5.000000e-01 : f32
    %30 = vector.broadcast %cst_9 : f32 to vector<1x256xf32>
    %31 = arith.mulf %22, %30 : vector<1x256xf32>
    %cst_10 = arith.constant 5.000000e-01 : f32
    %32 = vector.broadcast %cst_10 : f32 to vector<1x256xf32>
    %33 = arith.mulf %25, %32 : vector<1x256xf32>
    %34 = arith.subf %4, %27 : vector<1x256xf32>
    %35 = arith.subf %7, %29 : vector<1x256xf32>
    %36 = arith.addf %4, %27 : vector<1x256xf32>
    %37 = arith.addf %7, %29 : vector<1x256xf32>
    %38 = arith.subf %16, %31 : vector<1x256xf32>
    %39 = arith.subf %19, %33 : vector<1x256xf32>
    %40 = arith.addf %16, %31 : vector<1x256xf32>
    %41 = arith.addf %19, %33 : vector<1x256xf32>
    %42 = arith.mulf %10, %13 : vector<1x256xf32>
    %43 = arith.mulf %22, %25 : vector<1x256xf32>
    %44 = arith.minimumf %36, %40 : vector<1x256xf32>
    %45 = arith.maximumf %34, %38 : vector<1x256xf32>
    %46 = arith.subf %44, %45 : vector<1x256xf32>
    %cst_11 = arith.constant 0.000000e+00 : f32
    %47 = vector.broadcast %cst_11 : f32 to vector<1x256xf32>
    %48 = arith.maximumf %46, %47 : vector<1x256xf32>
    %49 = arith.minimumf %37, %41 : vector<1x256xf32>
    %50 = arith.maximumf %35, %39 : vector<1x256xf32>
    %51 = arith.subf %49, %50 : vector<1x256xf32>
    %cst_12 = arith.constant 0.000000e+00 : f32
    %52 = vector.broadcast %cst_12 : f32 to vector<1x256xf32>
    %53 = arith.maximumf %51, %52 : vector<1x256xf32>
    %54 = arith.mulf %48, %53 : vector<1x256xf32>
    %55 = arith.addf %42, %43 : vector<1x256xf32>
    %56 = arith.subf %55, %54 : vector<1x256xf32>
    %cst_13 = arith.constant 1.000000e-07 : f32
    %57 = vector.broadcast %cst_13 : f32 to vector<1x256xf32>
    %58 = arith.addf %56, %57 : vector<1x256xf32>
    %59 = arith.divf %54, %58 : vector<1x256xf32>
    %60 = arith.subf %16, %4 : vector<1x256xf32>
    %61 = arith.mulf %60, %60 : vector<1x256xf32>
    %62 = arith.subf %19, %7 : vector<1x256xf32>
    %63 = arith.mulf %62, %62 : vector<1x256xf32>
    %64 = arith.addf %61, %63 : vector<1x256xf32>
    %65 = arith.maximumf %36, %40 : vector<1x256xf32>
    %66 = arith.minimumf %34, %38 : vector<1x256xf32>
    %67 = arith.subf %65, %66 : vector<1x256xf32>
    %68 = arith.maximumf %37, %41 : vector<1x256xf32>
    %69 = arith.minimumf %35, %39 : vector<1x256xf32>
    %70 = arith.subf %68, %69 : vector<1x256xf32>
    %71 = arith.mulf %67, %67 : vector<1x256xf32>
    %72 = arith.mulf %70, %70 : vector<1x256xf32>
    %73 = arith.addf %71, %72 : vector<1x256xf32>
    %cst_14 = arith.constant 1.000000e-07 : f32
    %74 = vector.broadcast %cst_14 : f32 to vector<1x256xf32>
    %75 = arith.addf %73, %74 : vector<1x256xf32>
    %76 = arith.divf %64, %75 : vector<1x256xf32>
    %77 = arith.subf %59, %76 : vector<1x256xf32>
    %cst_15 = arith.constant -1.000000e+00 : f32
    %cst_16 = arith.constant 1.000000e+00 : f32
    %78 = vector.broadcast %cst_15 : f32 to vector<1x256xf32>
    %79 = arith.maximumf %78, %77 : vector<1x256xf32>
    %80 = vector.broadcast %cst_16 : f32 to vector<1x256xf32>
    %81 = arith.minimumf %80, %79 : vector<1x256xf32>
    %82 = arith.index_cast %1 : i32 to index
    %c0_17 = arith.constant 0 : index
    %83 = vector.load %arg2[%82, %c0_17] : memref<1x256xf32, #tpu.memory_space<vmem>>, vector<1x256xf32>
    tpu.vector_store %arg2[%82, %c0_17], %81 {strides = array<i32>} : memref<1x256xf32, #tpu.memory_space<vmem>>, vector<1x256xf32>,
    %c1_i32_18 = arith.constant 1 : i32
    return
  }
  func.func @transform_0(%arg0: i32) -> (i32, i32, i32) {
    %c0_i32 = arith.constant 0 : i32
    %c0_i32_0 = arith.constant 0 : i32
    %c0_i32_1 = arith.constant 0 : i32
    return %c0_i32, %arg0, %c0_i32_0 : i32, i32, i32
  }
  func.func @transform_1(%arg0: i32) -> (i32, i32) {
    %c0_i32 = arith.constant 0 : i32
    %c0_i32_0 = arith.constant 0 : i32
    return %arg0, %c0_i32 : i32, i32
  }
}

</mosaic_0001>

<bundles_post_ra>
// kernel: tpu_custom_call.1
= control target key start
LH: loop header
LB: loop body
LE: loop exit
PB: predicated region body
PF: predicated region fallthrough
CT: control target
= control target key end

     0   :  { %6 = vsyncpa [#allocation3], 0  ;;  %s218_s0 = inlined_call_operand.hbm [shape: f32[8,1,256], index: 0, kind: input, shape index: {}]   ;;  %s219_s1 = inlined_call_operand.hbm [shape: f32[1,256], index: 1, kind: output, shape index: {}]  }
   0x1   :  { %7 = vsyncpa [#allocation4], 0  ;;  %s180_s6 = smov [#allocation2]   ;;  %s132_s10 = scalar_lea.hbm %s218_s0, 256 }
   0x2   :  { %s13_s7 = sshll.u32 %s180_s6, 4  ;;  %p133_p0 = scmp.ne.s32.totalorder %s218_s0, %s132_s10  ;;  %s14_s7 = int_to_ptr.vmem [resolvable:$true] %s13_s7 }
   0x3   :  { %p136_p1 = scmp.lt.u32.totalorder %s132_s10, %s218_s0 }
   0x5   :  { %p138_p2 = pnand %p136_p1, %p133_p0 }
   0x7   :  { %141 = shalt.err (!%p138_p2)
}
   0x8   :  { %s142_s15 = scalar_lea.vmem %s14_s7, 256  ;;  %p147_p4 = scmp.lt.s32.totalorder %s14_s7, %s14_s7 }
   0x9   :  { %p143_p3 = scmp.ne.s32.totalorder %s14_s7, %s142_s15  ;;  %p148_p5 = scmp.lt.s32.totalorder %s142_s15, %s142_s15 }
   0xb   :  { %p149_p6 = por %p148_p5, %p147_p4 }
   0xd   :  { %p150_p7 = pnand %p149_p6, %p143_p3 }
   0xf   :  { %153 = shalt.err (!%p150_p7)
}
  0x10   :  { %s181_s16 = smov 32   ;;  %s182_s17 = smov 2  }
  0x11   :  { %19 = dma.hbm_to_vmem [thread:$0]  %s218_s0, 256, %s14_s7, [#allocation3], %s181_s16, %s181_s16, %s182_s17  }
  0x12   :  { %176 = dma.done.wait [#allocation3], 256  }
  0x13   :  { %177 = vsyncadd [#allocation3], 4294967040  ;;  %v25_v0 = vld [vmem:[#allocation2] sm:$0x3]  ;;  %v28_v1 = vld [vmem:[#allocation2 + $0x2] sm:$0x3]  ;;  %v96_v52 = vlaneseq }
  0x14   :  { %v31_v2 = vld [vmem:[#allocation2 + $0x4] sm:$0x3]  ;;  %v34_v3 = vld [vmem:[#allocation2 + $0x6] sm:$0x3]  ;;  %v37_v4 = vld [vmem:[#allocation2 + $0x8] sm:$0x3] }
  0x15   :  { %v40_v5 = vld [vmem:[#allocation2 + $0xa] sm:$0x3]  ;;  %v43_v6 = vld [vmem:[#allocation2 + $0xc] sm:$0x3]  ;;  %v46_v7 = vld [vmem:[#allocation2 + $0xe] sm:$0x3]  ;;  %v59_v20 = vmul.f32 %v34_v3, %v31_v2  ;;  %v75_v44 = vsub.f32 %v37_v4, %v25_v0 }
  0x16   :  { %v47_v8 = vmul.f32 0.5, %v31_v2  ;;  %v48_v9 = vmul.f32 0.5, %v34_v3  ;;  %v49_v10 = vmul.f32 0.5, %v43_v6  ;;  %v50_v11 = vmul.f32 0.5, %v46_v7  ;;  %s183_s0 = smov [#allocation5]  }
  0x17   :  { %v60_v21 = vmul.f32 %v46_v7, %v43_v6  ;;  %v77_v45 = vsub.f32 %v40_v5, %v28_v1  ;;  %v76_v46 = vmul.f32 %v75_v44, %v75_v44  ;;  %s107_s20 = sshll.u32 %s183_s0, 4  ;;  %vm98_vm0 = vcmp.lt.s32.totalorder %v96_v52, 256  ;;  %s108_s20 = int_to_ptr.vmem [resolvable:$true] %s107_s20 }
  0x18   :  { %v51_v12 = vsub.f32 %v25_v0, %v47_v8  ;;  %v52_v13 = vsub.f32 %v28_v1, %v48_v9  ;;  %v53_v14 = vadd.f32 %v47_v8, %v25_v0  ;;  %v54_v15 = vadd.f32 %v48_v9, %v28_v1  ;;  %s154_s21 = scalar_lea.vmem %s108_s20, 32  ;;  %p159_p9 = scmp.lt.s32.totalorder %s108_s20, %s108_s20 }
  0x19   :  { %v55_v16 = vsub.f32 %v37_v4, %v49_v10  ;;  %v56_v17 = vsub.f32 %v40_v5, %v50_v11  ;;  %v57_v18 = vadd.f32 %v49_v10, %v37_v4  ;;  %v58_v19 = vadd.f32 %v50_v11, %v40_v5  ;;  %p155_p8 = scmp.ne.s32.totalorder %s108_s20, %s154_s21  ;;  %p160_p10 = scmp.lt.s32.totalorder %s154_s21, %s154_s21 }
  0x1a   :  { %v70_v35 = vadd.f32 %v60_v21, %v59_v20  ;;  %v78_v47 = vmul.f32 %v77_v45, %v77_v45 }
  0x1b   :  { %v61_v22 = vmin.f32 %v53_v14, %v57_v18  ;;  %v62_v23 = vmax.f32 %v51_v12, %v55_v16  ;;  %v65_v24 = vmin.f32 %v54_v15, %v58_v19  ;;  %v66_v25 = vmax.f32 %v52_v13, %v56_v17  ;;  %p161_p11 = por %p160_p10, %p159_p9 }
  0x1c   :  { %v80_v26 = vmax.f32 %v53_v14, %v57_v18  ;;  %v81_v27 = vmin.f32 %v51_v12, %v55_v16  ;;  %v83_v28 = vmax.f32 %v54_v15, %v58_v19  ;;  %v84_v31 = vmin.f32 %v52_v13, %v56_v17 }
  0x1d   :  { %v63_v29 = vsub.f32 %v61_v22, %v62_v23  ;;  %v67_v30 = vsub.f32 %v65_v24, %v66_v25  ;;  %v79_v48 = vadd.f32 %v78_v47, %v76_v46  ;;  %p162_p12 = pnand %p161_p11, %p155_p8 }
  0x1e   :  { %v82_v32 = vsub.f32 %v80_v26, %v81_v27  ;;  %v85_v36 = vsub.f32 %v83_v28, %v84_v31 }
  0x1f   :  { %v64_v33 = vmax.f32 %v63_v29, 0.0  ;;  %v68_v34 = vmax.f32 %v67_v30, 0.0 }
  0x20   :  { %v86_v37 = vmul.f32 %v82_v32, %v82_v32  ;;  %v87_v39 = vmul.f32 %v85_v36, %v85_v36 }
  0x21   :  { %v69_v38 = vmul.f32 %v68_v34, %v64_v33 }
  0x22   :  { %v88_v41 = vadd.f32 %v87_v39, %v86_v37 }
  0x23   :  { %v71_v40 = vsub.f32 %v70_v35, %v69_v38 }
  0x24   :  { %v89_v43 = vadd.f32 1e-07, %v88_v41 }
  0x25   :  { %v72_v42 = vadd.f32 1e-07, %v71_v40 }
  0x27   :  { %128 = vrcp.f32 %v72_v42 }
  0x28   :  { %130 = vrcp.f32 %v89_v43 }
  0x31   :  { %v129_v49 = vpop.eup %128 }
  0x32   :  { %v131_v50 = vpop.eup %130  ;;  %v74_v51 = vmul.f32 %v129_v49, %v69_v38 }
  0x33   :  { %v91_v53 = vmul.f32 %v131_v50, %v79_v48 }
  0x35   :  { %v92_v54 = vsub.f32 %v74_v51, %v91_v53 }
  0x37   :  { %v123_v55 = vclamps-f32 %v92_v54, 1.0 }
  0x39   :  { %100 = vst.msk [vmem:[#allocation5] sm:$0x3] %vm98_vm0, %v123_v55 }
  0x3a   :  { %165 = shalt.err (!%p162_p12)
}
  0x3b   :  { %s166_s24 = scalar_lea.hbm %s219_s1, 32 }
  0x3c   :  { %p167_p13 = scmp.ne.s32.totalorder %s219_s1, %s166_s24  ;;  %p170_p0 = scmp.lt.u32.totalorder %s166_s24, %s219_s1 }
  0x3e   :  { %p172_p1 = pnand %p170_p0, %p167_p13 }
  0x40   :  { %175 = shalt.err (!%p172_p1)
}
  0x41   :  { %110 = dma.vmem_to_hbm [thread:$0]  %s108_s20, 32, %s219_s1, [#allocation4]  }
  0x42   :  { %178 = dma.done.wait [#allocation4], 32  }
  0x43   :  { %179 = vsyncadd [#allocation4], 4294967264 }
  0x44   :  { %114 = vsyncpa [#allocation3], 1 }
  0x45   :  { %115 = vsyncpa [#allocation4], 1 }

</bundles_post_ra>
